<compile_context>
chip_gen: v7x
topology: tpu7x:2x2x1
jax: 0.10.0
libtpu: 0.0.40
codegen_flags: <defaults>
</compile_context>

<pallas_src>
import jax
import jax.numpy as jnp
import numpy as np
from jax import lax
from jax.experimental import pallas as pl
from jax.experimental.pallas import tpu as pltpu

# --------------------------------------------------------------------------
# Module hyper-parameters (synthetic, small)
# --------------------------------------------------------------------------
STYLE_DIM    = 32
IN_CHANNELS  = 8
OUT_CHANNELS = 8
GROUPS       = 2
STYLE_KERNEL = 3          # input spatial size == predicted kernel size
BATCH        = 2

DW_OUT = OUT_CHANNELS * (IN_CHANNELS // GROUPS)    # 3x3-conv predictor out channels (32)
PW_OUT = OUT_CHANNELS * (OUT_CHANNELS // GROUPS)   # 1x1-conv predictor out channels (32)

N_SP     = STYLE_KERNEL * STYLE_KERNEL             # 9 spatial positions
IN_COLS  = STYLE_DIM * N_SP                        # 288 contraction depth
DW_COLS  = N_SP * DW_OUT                           # 288 dw output lanes (oc*9 + p)
PW_OFF   = DW_COLS                                 # 288
B_OFF    = PW_OFF + PW_OUT                         # 320
TOTAL    = B_OFF + OUT_CHANNELS                    # 328
LANE     = 128
OUT_LANES = ((TOTAL + LANE - 1) // LANE) * LANE    # 384 -> lane-dense (3 x 128)


# --------------------------------------------------------------------------
# Single fused Pallas kernel: one MXU matmul + bias row from the same slab
# --------------------------------------------------------------------------
def _fused_predictor_kernel(x_ref, slab_ref, out_ref):
    # x: (B, 288) f32   slab: (289, 384) bf16 (row 288 = bias)   out: (B, 384) f32
    x = x_ref[...].astype(jnp.bfloat16)                        # single bf16 MXU pass
    acc = jnp.dot(x, slab_ref[:IN_COLS, :],                    # static, tile-aligned view
                  preferred_element_type=jnp.float32)
    out_ref[...] = acc + slab_ref[IN_COLS:, :].astype(jnp.float32)


# --------------------------------------------------------------------------
# One-time parameter folding (outside jit / per-call path)
# --------------------------------------------------------------------------
def fold_params(params):
    """Fold reflect-pad 3x3 conv, avg-pool and both 1x1 heads into one bf16
    (289, 384) slab (last row = bias). Row index (contraction) = c*9 + q,
    matching w.reshape(B, S*K*K). dw columns ordered oc*9 + p so the wrapper
    unpack is a pure contiguous reshape (no transpose)."""
    S, K = STYLE_DIM, STYLE_KERNEL
    refl = [1, 0, 1, 2, 1]   # ReflectionPad2d(1) index map for a size-3 axis

    dw_w = np.asarray(params["dw_w"], np.float32)                    # (DW_OUT, S, 3, 3)
    dw_b = np.asarray(params["dw_b"], np.float32)                    # (DW_OUT,)
    pw_w = np.asarray(params["pw_w"], np.float32).reshape(PW_OUT, S) # (PW_OUT, S)
    pw_b = np.asarray(params["pw_b"], np.float32)                    # (PW_OUT,)
    b_w  = np.asarray(params["b_w"],  np.float32).reshape(OUT_CHANNELS, S)
    b_b  = np.asarray(params["b_b"],  np.float32)

    w_big = np.zeros((IN_COLS, OUT_LANES), np.float32)
    b_big = np.zeros((OUT_LANES,), np.float32)

    # --- depthwise-kernel predictor: 3x3 conv with reflect pad, folded.
    # w_big[c*9 + q, oc*9 + p] = sum_{(dy,dx): refl maps (p,dy,dx)->q} dw_w[oc,c,dy,dx]
    rows_c = np.arange(S) * N_SP          # row base per style channel
    cols_o = np.arange(DW_OUT) * N_SP     # col base per dw output channel
    for y in range(K):
        for x in range(K):
            p = y * K + x
            for dy in range(3):
                for dx in range(3):
                    q = refl[y + dy] * K + refl[x + dx]
                    w_big[np.ix_(rows_c + q, cols_o + p)] += dw_w[:, :, dy, dx].T
    b_big[:DW_COLS] = np.repeat(dw_b, N_SP)            # col oc*9+p -> dw_b[oc]

    # --- pooled 1x1 heads: AdaptiveAvgPool2d((1,1)) folded as 1/9 per spatial row.
    w_big[:, PW_OFF:PW_OFF + PW_OUT] = np.repeat(pw_w.T, N_SP, axis=0) / N_SP
    b_big[PW_OFF:PW_OFF + PW_OUT] = pw_b
    w_big[:, B_OFF:B_OFF + OUT_CHANNELS] = np.repeat(b_w.T, N_SP, axis=0) / N_SP
    b_big[B_OFF:B_OFF + OUT_CHANNELS] = b_b

    # Bias packed as the last row of the SAME slab -> one input, one DMA.
    slab = np.concatenate([w_big, b_big[None, :]], axis=0)     # (289, 384)
    return {"slab": jnp.asarray(slab, jnp.bfloat16)}           # bf16: halves weight DMA


# --------------------------------------------------------------------------
# Forward: one pallas_call + contiguous reshapes only (no transpose)
# --------------------------------------------------------------------------
def kernel_predictor_forward(w, folded):
    B = w.shape[0]
    # (B, S, K, K) -> (B, S*K*K); contiguous flatten, matches slab row order.
    x = w.reshape(B, IN_COLS)

    vmem = pl.BlockSpec(memory_space=pltpu.MemorySpace.VMEM)
    cost = pl.CostEstimate(
        flops=2 * B * IN_COLS * OUT_LANES,
        bytes_accessed=(B * IN_COLS * 4                     # x (f32)
                        + (IN_COLS + 1) * OUT_LANES * 2     # slab (bf16)
                        + B * OUT_LANES * 4),               # out (f32)
        transcendentals=0)

    out = pl.pallas_call(
        _fused_predictor_kernel,
        out_shape=jax.ShapeDtypeStruct((B, OUT_LANES), jnp.float32),
        in_specs=[vmem, vmem],
        out_specs=vmem,
        cost_estimate=cost,
    )(x, folded["slab"])

    # strip padding lanes and unpack the three heads (contiguous reshapes only)
    dw_kernel = out[:, :DW_COLS].reshape(
        B, OUT_CHANNELS, IN_CHANNELS // GROUPS, STYLE_KERNEL, STYLE_KERNEL)
    pw_kernel = out[:, PW_OFF:PW_OFF + PW_OUT].reshape(
        B, OUT_CHANNELS, OUT_CHANNELS // GROUPS, 1, 1)
    bias = out[:, B_OFF:B_OFF + OUT_CHANNELS]
    return dw_kernel, pw_kernel, bias


# --------------------------------------------------------------------------
# Pure-JAX reference (un-folded conv / pool) for a correctness sanity check
# --------------------------------------------------------------------------
def reference_forward(w, params):
    w_pad = jnp.pad(w, ((0, 0), (0, 0), (1, 1), (1, 1)), mode="reflect")
    dw = lax.conv_general_dilated(
        w_pad, params["dw_w"], window_strides=(1, 1), padding="VALID",
        dimension_numbers=("NCHW", "OIHW", "NCHW"))
    dw = dw + params["dw_b"][None, :, None, None]
    dw_kernel = dw.reshape(BATCH, OUT_CHANNELS, IN_CHANNELS // GROUPS,
                           STYLE_KERNEL, STYLE_KERNEL)
    pooled = jnp.mean(w, axis=(2, 3))                       # (B, S)
    pw = pooled @ params["pw_w"].reshape(PW_OUT, STYLE_DIM).T + params["pw_b"]
    pw_kernel = pw.reshape(BATCH, OUT_CHANNELS, OUT_CHANNELS // GROUPS, 1, 1)
    bias = pooled @ params["b_w"].reshape(OUT_CHANNELS, STYLE_DIM).T + params["b_b"]
    return dw_kernel, pw_kernel, bias


# --------------------------------------------------------------------------
# Deterministic parameter init (matches nn.Conv2d weight shapes, OIHW)
# --------------------------------------------------------------------------
def init_params(key):
    ks = jax.random.split(key, 6)
    scale = 0.05
    return {
        "dw_w": scale * jax.random.normal(ks[0], (DW_OUT, STYLE_DIM, 3, 3), jnp.float32),
        "dw_b": scale * jax.random.normal(ks[1], (DW_OUT,), jnp.float32),
        "pw_w": scale * jax.random.normal(ks[2], (PW_OUT, STYLE_DIM, 1, 1), jnp.float32),
        "pw_b": scale * jax.random.normal(ks[3], (PW_OUT,), jnp.float32),
        "b_w": scale * jax.random.normal(ks[4], (OUT_CHANNELS, STYLE_DIM, 1, 1), jnp.float32),
        "b_b": scale * jax.random.normal(ks[5], (OUT_CHANNELS,), jnp.float32),
    }


if __name__ == "__main__":
    key = jax.random.PRNGKey(0)
    k_in, k_par = jax.random.split(key)
    w = jax.random.normal(k_in, (BATCH, STYLE_DIM, STYLE_KERNEL, STYLE_KERNEL),
                          jnp.float32)
    params = init_params(k_par)

    # fold once (outside the per-call path); jit the thin forward wrapper
    folded = fold_params(params)
    fwd = jax.jit(kernel_predictor_forward)

    dw_kernel, pw_kernel, bias = jax.block_until_ready(fwd(w, folded))

    # sanity check vs pure-JAX reference.  Tolerance reflects the bf16 folded
    # weight slab (single bf16 MXU pass, f32 accumulation): expected |err| ~3e-3.
    dw_ref, pw_ref, bias_ref = reference_forward(w, params)
    assert dw_kernel.shape == (BATCH, OUT_CHANNELS, IN_CHANNELS // GROUPS,
                               STYLE_KERNEL, STYLE_KERNEL)
    assert pw_kernel.shape == (BATCH, OUT_CHANNELS, OUT_CHANNELS // GROUPS, 1, 1)
    assert bias.shape == (BATCH, OUT_CHANNELS)
    np.testing.assert_allclose(np.asarray(dw_kernel), np.asarray(dw_ref),
                               rtol=1e-2, atol=1e-2)
    np.testing.assert_allclose(np.asarray(pw_kernel), np.asarray(pw_ref),
                               rtol=1e-2, atol=1e-2)
    np.testing.assert_allclose(np.asarray(bias), np.asarray(bias_ref),
                               rtol=1e-2, atol=1e-2)

    print("KERNEL_OK")
</pallas_src>

<mosaic_0001>
module attributes {stable_mosaic.version = 11 : i64} {
  func.func @_fused_predictor_kernel(%arg0: memref<2x288xf32, #tpu.memory_space<vmem>>, %arg1: memref<289x384xbf16, #tpu.memory_space<vmem>>, %arg2: memref<2x384xf32, #tpu.memory_space<vmem>>) attributes {dimension_semantics = [], scalar_prefetch = 0 : i64, scratch_operands = 0 : i64, tpu.core_type = #tpu.core_type<tc>} {
    %c0 = arith.constant 0 : index
    %c0_0 = arith.constant 0 : index
    %0 = vector.load %arg0[%c0, %c0_0] : memref<2x288xf32, #tpu.memory_space<vmem>>, vector<2x288xf32>
    %1 = arith.truncf %0 : vector<2x288xf32> to vector<2x288xbf16>
    %c0_1 = arith.constant 0 : index
    %c0_2 = arith.constant 0 : index
    %2 = vector.load %arg1[%c0_1, %c0_2] : memref<289x384xbf16, #tpu.memory_space<vmem>>, vector<288x384xbf16>
    %cst = arith.constant dense<0.000000e+00> : vector<2x384xf32>
    %3 = tpu.matmul %1, %2, %cst {dimension_numbers = #tpu.dot_dimension_numbers<[1], [0], [0], [1], [0, 0, 1, 1], [], []>} : vector<2x288xbf16>, vector<288x384xbf16>, vector<2x384xf32> -> vector<2x384xf32>
    %c288 = arith.constant 288 : index
    %c0_3 = arith.constant 0 : index
    %4 = vector.load %arg1[%c288, %c0_3] : memref<289x384xbf16, #tpu.memory_space<vmem>>, vector<1x384xbf16>
    %5 = arith.extf %4 : vector<1x384xbf16> to vector<1x384xf32>
    %6 = vector.broadcast %5 : vector<1x384xf32> to vector<2x384xf32>
    %7 = arith.addf %3, %6 : vector<2x384xf32>
    %c0_4 = arith.constant 0 : index
    %c0_5 = arith.constant 0 : index
    %8 = vector.load %arg2[%c0_4, %c0_5] : memref<2x384xf32, #tpu.memory_space<vmem>>, vector<2x384xf32>
    tpu.vector_store %arg2[%c0_4, %c0_5], %7 {strides = array<i32>} : memref<2x384xf32, #tpu.memory_space<vmem>>, vector<2x384xf32>,
    return
  }
}

</mosaic_0001>

<bundles_post_ra>
// kernel: kernel_predictor_forward.1
= control target key start
LH: loop header
LB: loop body
LE: loop exit
PB: predicated region body
PF: predicated region fallthrough
CT: control target
= control target key end

     0   :  { %v774_v1 = vmov 0   ;;  %v775_v6 = vmov 1983009808   ;;  %v18_v8 = vlaneseq  ;;  %vm413_vm0 = vcmask 261120   ;;  %s989_s1 = inlined_call_operand.vmem [shape: bf16[289,384], index: 1, kind: input, shape index: {}]   ;;  %s990_s0 = inlined_call_operand.vmem [shape: f32[2,288], index: 0, kind: input, shape index: {}]   ;;  %s991_s2 = inlined_call_operand.vmem [shape: f32[2,384], index: 2, kind: output, shape index: {}]  }
   0x1   :  { %v701_v0 = vld [vmem:[%s989_s1 + $0x4] ss:$12 sps:$4 sm:$0xff]   ;;  %490 = vmatprep.mubr.bf16.mxu1 %v774_v1  ;;  %v703_v2 = vld [vmem:[%s989_s1] ss:$12 sps:$4 sm:$0xff]   ;;  %v704_v3 = vld [vmem:[%s989_s1 + $0x1c] ss:$12 sps:$4 sm:$0xff]   ;;  %v16_v7 = vunpack.c.l.s4 %v775_v6 }
   0x2   :  { %417 = vmatprep.subr.bf16.mxu0 %v701_v0  ;;  %v706_v4 = vld [vmem:[%s989_s1 + $0x18] ss:$12 sps:$4 sm:$0xff]   ;;  %v707_v5 = vld [vmem:[%s989_s1 + $0x34] ss:$12 sps:$4 sm:$0xff]   ;;  %v709_v9 = vld [vmem:[%s989_s1 + $0x30] ss:$12 sps:$4 sm:$0xff]  }
   0x3   :  { %418 = vmatpush1.bf16.msra.mxu0 %v703_v2  ;;  %v716_v10 = vld [vmem:[%s989_s1 + $0x184] ss:$12 sps:$4 sm:$0xff]   ;;  %v718_v11 = vld [vmem:[%s989_s1 + $0x180] ss:$12 sps:$4 sm:$0xff]   ;;  %v17_v13 = vunpack.c.0.s8 %v16_v7  ;;  %v820_v14 = vshrl.u32 %v18_v8, 7  ;;  %v776_v63 = vmov 0.0  }
   0x4   :  { %419 = vmatprep.subr.bf16.mxu0 %v704_v3  ;;  %v710_v12 = vld [vmem:[%s989_s1 + $0x4c] ss:$12 sps:$4 sm:$0xff]   ;;  %458 = vmatprep.subr.bf16.mxu1 %v716_v10  ;;  %v722_v15 = vld [vmem:[%s989_s1 + $0x19c] ss:$12 sps:$4 sm:$0xff]   ;;  %v713_v18 = vld [vmem:[%s989_s1 + $0x64] ss:$12 sps:$4 sm:$0xff]  }
   0x5   :  { %459 = vmatpush1.bf16.msra.mxu1 %v718_v11  ;;  %v724_v16 = vld [vmem:[%s989_s1 + $0x198] ss:$12 sps:$4 sm:$0xff]   ;;  %v712_v17 = vld [vmem:[%s989_s1 + $0x48] ss:$12 sps:$4 sm:$0xff]   ;;  %v838_v20 = vsub.s32 %v17_v13, %v820_v14  ;;  %v715_v24 = vld [vmem:[%s989_s1 + $0x60] ss:$12 sps:$4 sm:$0xff]  }
   0x6   :  { %460 = vmatprep.subr.bf16.mxu1 %v722_v15  ;;  %v728_v19 = vld [vmem:[%s989_s1 + $0xc8] ss:$12 sps:$4 sm:$0xff]   ;;  %v12_v21 = vld [vmem:[%s990_s0] sm:$0x3f]  ;;  %v727_v36 = vld [vmem:[%s989_s1 + $0x90] ss:$12 sps:$4 sm:$0xff]  }
   0x7   :  { %420 = vmatpush1.bf16.msra.mxu0 %v706_v4  ;;  %v14_v22 = vcombine.high %v12_v21, %v12_v21  ;;  %v844_v23 = vrot.slane %v12_v21, %v838_v20  ;;  %v719_v25 = vld [vmem:[%s989_s1 + $0x7c] ss:$12 sps:$4 sm:$0xff]   ;;  %v734_v30 = vld [vmem:[%s989_s1 + $0xe0] ss:$12 sps:$4 sm:$0xff]   ;;  %v721_v32 = vld [vmem:[%s989_s1 + $0x78] ss:$12 sps:$4 sm:$0xff]  }
   0x8   :  { %421 = vmatprep.subr.bf16.mxu0 %v707_v5  ;;  %v730_v28 = vld [vmem:[%s989_s1 + $0x8] ss:$12 sps:$4 sm:$0xff]   ;;  %v735_v34 = vld [vmem:[%s989_s1 + $0x20] ss:$12 sps:$4 sm:$0xff]   ;;  %v739_v35 = vld [vmem:[%s989_s1 + $0xf8] ss:$12 sps:$4 sm:$0xff]  }
   0x9   :  { %461 = vmatpush1.bf16.msra.mxu1 %v724_v16  ;;  %v28_v26 = vrot.slane %v14_v22, %v838_v20  ;;  %v29_v27 = vcombine.high %v844_v23, %v844_v23  ;;  %v725_v33 = vld [vmem:[%s989_s1 + $0x94] ss:$12 sps:$4 sm:$0xff]   ;;  %v731_v37 = vld [vmem:[%s989_s1 + $0xac] ss:$12 sps:$4 sm:$0xff]   ;;  %v744_v39 = vld [vmem:[%s989_s1 + $0x110] ss:$12 sps:$4 sm:$0xff]   ;;  %v33_v61 = vpack.c.bf16 %v844_v23, %v844_v23 }
   0xa   :  { %660 = vmatprep.subr.bf16.mxu1 %v728_v19  ;;  %v740_v38 = vld [vmem:[%s989_s1 + $0x38] ss:$12 sps:$4 sm:$0xff]   ;;  %v733_v40 = vld [vmem:[%s989_s1 + $0xa8] ss:$12 sps:$4 sm:$0xff]   ;;  %v745_v42 = vld [vmem:[%s989_s1 + $0x50] ss:$12 sps:$4 sm:$0xff]  }
   0xb   :  { %422 = vmatpush1.bf16.msra.mxu0 %v709_v9  ;;  %v858_v29 = vpack.c.bf16 %v28_v26, %v28_v26  ;;  %v34_v31 = vpack.c.bf16 %v29_v27, %v29_v27  ;;  %v736_v41 = vld [vmem:[%s989_s1 + $0xc4] ss:$12 sps:$4 sm:$0xff]   ;;  %v749_v43 = vld [vmem:[%s989_s1 + $0x128] ss:$12 sps:$4 sm:$0xff]   ;;  %v738_v44 = vld [vmem:[%s989_s1 + $0xc0] ss:$12 sps:$4 sm:$0xff]  }
   0xc   :  { %423 = vmatprep.subr.bf16.mxu0 %v710_v12  ;;  %v741_v45 = vld [vmem:[%s989_s1 + $0xdc] ss:$12 sps:$4 sm:$0xff]   ;;  %v754_v47 = vld [vmem:[%s989_s1 + $0x140] ss:$12 sps:$4 sm:$0xff]   ;;  %v743_v48 = vld [vmem:[%s989_s1 + $0xd8] ss:$12 sps:$4 sm:$0xff]  }
   0xd   :  { %658 = vmatmul.mubr.msk.bf16.vlgmr.msra.gmra.mrb[0].mxu1 %vm413_vm0, %v858_v29  ;;  %449 = vmatprep.mubr.bf16.mxu0 %v34_v31  ;;  %v750_v46 = vld [vmem:[%s989_s1 + $0x68] ss:$12 sps:$4 sm:$0xff]   ;;  %v755_v50 = vld [vmem:[%s989_s1 + $0x80] ss:$12 sps:$4 sm:$0xff]   ;;  %v759_v51 = vld [vmem:[%s989_s1 + $0x158] ss:$12 sps:$4 sm:$0xff]  }
   0xe   :  { %661 = vmatpush3.bf16.msra.mxu1 %v730_v28  ;;  %531 = vmatprep.mubr.bf16.mxu1 %v34_v31  ;;  %v746_v49 = vld [vmem:[%s989_s1 + $0xf4] ss:$12 sps:$4 sm:$0xff]   ;;  %v748_v52 = vld [vmem:[%s989_s1 + $0xf0] ss:$12 sps:$4 sm:$0xff]   ;;  %v751_v53 = vld [vmem:[%s989_s1 + $0x10c] ss:$12 sps:$4 sm:$0xff]  }
   0xf   :  { %424 = vmatpush1.bf16.msra.mxu0 %v712_v17  ;;  %662 = vmatprep.subr.bf16.mxu1 %v734_v30  ;;  %v760_v54 = vld [vmem:[%s989_s1 + $0x98] ss:$12 sps:$4 sm:$0xff]   ;;  %v764_v55 = vld [vmem:[%s989_s1 + $0x170] ss:$12 sps:$4 sm:$0xff]   ;;  %v753_v56 = vld [vmem:[%s989_s1 + $0x108] ss:$12 sps:$4 sm:$0xff]  }
  0x10   :  { %425 = vmatprep.subr.bf16.mxu0 %v713_v18  ;;  %v756_v57 = vld [vmem:[%s989_s1 + $0x124] ss:$12 sps:$4 sm:$0xff]   ;;  %v758_v59 = vld [vmem:[%s989_s1 + $0x120] ss:$12 sps:$4 sm:$0xff]   ;;  %v761_v60 = vld [vmem:[%s989_s1 + $0x13c] ss:$12 sps:$4 sm:$0xff]  }
  0x11   :  { %v765_v58 = vld [vmem:[%s989_s1 + $0xb0] ss:$12 sps:$4 sm:$0xff]   ;;  %v769_v62 = vld [vmem:[%s989_s1 + $0x188] ss:$12 sps:$4 sm:$0xff]   ;;  %v763_v0 = vld [vmem:[%s989_s1 + $0x138] ss:$12 sps:$4 sm:$0xff]  }
  0x12   :  { %663 = vmatpush3.bf16.msra.mxu1 %v735_v34  ;;  %v766_v1 = vld [vmem:[%s989_s1 + $0x154] ss:$12 sps:$4 sm:$0xff]   ;;  %vm777_vm1 = vmmov 0   ;;  %v768_v3 = vld [vmem:[%s989_s1 + $0x150] ss:$12 sps:$4 sm:$0xff]   ;;  %v115_v11 = vsub.s32 0, %v820_v14 }
  0x13   :  { %426 = vmatpush1.bf16.msra.mxu0 %v715_v24  ;;  %664 = vmatprep.subr.bf16.mxu1 %v739_v35  ;;  %v773_v2 = vld [vmem:[%s989_s1 + $0x1a0] ss:$12 sps:$4 sm:$0xff]   ;;  %v772_v5 = vld [vmem:[%s989_s1 + $0x168] ss:$12 sps:$4 sm:$0xff]   ;;  %v109_v10 = vld [vmem:[%s989_s1 + $0x1b8] sm:$0x1] }
  0x14   :  { %427 = vmatprep.subr.bf16.mxu0 %v719_v25  ;;  %v770_v4 = vld [vmem:[%s989_s1 + $0x16c] ss:$12 sps:$4 sm:$0xff]   ;;  %v112_v12 = vunpack.c.l.bf16 %v109_v10  ;;  %v108_v21 = vld [vmem:[%s989_s1 + $0x1b0] sm:$0x11] }
  0x15   :  { %v110_v23 = vunpack.c.l.bf16 %v108_v21  ;;  %v111_v24 = vunpack.c.h.bf16 %v108_v21 }
  0x16   :  { %665 = vmatpush3.bf16.msra.mxu1 %v740_v38  ;;  %v124_v16 = vrot.slane %v112_v12, %v115_v11 }
  0x17   :  { %428 = vmatpush1.bf16.msra.mxu0 %v721_v32  ;;  %666 = vmatprep.subr.bf16.mxu1 %v744_v39  ;;  %v120_v30 = vrot.slane %v111_v24, %v115_v11 }
  0x18   :  { %429 = vmatprep.subr.bf16.mxu0 %v725_v33 }
  0x1a   :  { %667 = vmatpush3.bf16.msra.mxu1 %v745_v42 }
  0x1b   :  { %430 = vmatpush1.bf16.msra.mxu0 %v727_v36  ;;  %668 = vmatprep.subr.bf16.mxu1 %v749_v43 }
  0x1c   :  { %431 = vmatprep.subr.bf16.mxu0 %v731_v37 }
  0x1e   :  { %669 = vmatpush3.bf16.msra.mxu1 %v750_v46 }
  0x1f   :  { %432 = vmatpush1.bf16.msra.mxu0 %v733_v40  ;;  %670 = vmatprep.subr.bf16.mxu1 %v754_v47 }
  0x20   :  { %433 = vmatprep.subr.bf16.mxu0 %v736_v41 }
  0x22   :  { %671 = vmatpush3.bf16.msra.mxu1 %v755_v50 }
  0x23   :  { %434 = vmatpush1.bf16.msra.mxu0 %v738_v44  ;;  %672 = vmatprep.subr.bf16.mxu1 %v759_v51 }
  0x24   :  { %435 = vmatprep.subr.bf16.mxu0 %v741_v45 }
  0x26   :  { %673 = vmatpush3.bf16.msra.mxu1 %v760_v54 }
  0x27   :  { %436 = vmatpush1.bf16.msra.mxu0 %v743_v48  ;;  %674 = vmatprep.subr.bf16.mxu1 %v764_v55 }
  0x28   :  { %437 = vmatprep.subr.bf16.mxu0 %v746_v49 }
  0x2a   :  { %675 = vmatpush3.bf16.msra.mxu1 %v765_v58 }
  0x2b   :  { %438 = vmatpush1.bf16.msra.mxu0 %v748_v52  ;;  %685 = vmatprep.subr.bf16.mxu1 %v776_v63 }
  0x2c   :  { %439 = vmatprep.subr.bf16.mxu0 %v751_v53 }
  0x2d   :  { %532 = vmatmul.mubr.bf16.vlgmr.msra.gmra.mrb[4].mxu1 %v33_v61 }
  0x2e   :  { %686 = vmatpush3.bf16.msra.mxu1 %v769_v62  ;;  %689 = vmatprep.mubr.msk.bf16.mxu1 %vm777_vm1, %v776_v63 }
  0x2f   :  { %440 = vmatpush1.bf16.msra.mxu0 %v753_v56  ;;  %687 = vmatprep.subr.bf16.mxu1 %v776_v63 }
  0x30   :  { %441 = vmatprep.subr.bf16.mxu0 %v756_v57 }
  0x32   :  { %688 = vmatpush3.bf16.msra.mxu1 %v773_v2 }
  0x33   :  { %442 = vmatpush1.bf16.msra.mxu0 %v758_v59 }
  0x34   :  { %443 = vmatprep.subr.bf16.mxu0 %v761_v60 }
  0x35   :  { %690 = vmatmul.mubr.msk.bf16.vlgmr.msra.gmra.mrb[8].mxu1 %vm413_vm0, %v858_v29  ;;  %v116_v29 = vrot.slane %v110_v23, %v115_v11 }
  0x37   :  { %444 = vmatpush1.bf16.msra.mxu0 %v763_v0 }
  0x38   :  { %445 = vmatprep.subr.bf16.mxu0 %v766_v1 }
  0x3b   :  { %446 = vmatpush1.bf16.msra.mxu0 %v768_v3 }
  0x3c   :  { %447 = vmatprep.subr.bf16.mxu0 %v770_v4 }
  0x3f   :  { %448 = vmatpush1.bf16.msra.mxu0 %v772_v5 }
  0x42   :  { %450 = vmatmul.mubr.bf16.vlgmr.msra.gmra.mrb[0].mxu0 %v33_v61 }
  0xe0   :  { %v492_v6 = vpop.f32.mrb[0].mxu1 }
  0xe1   :  { %v494_v7 = vpop.f32.mrb[1].mxu1 }
  0xe2   :  { %v496_v8 = vpop.f32.mrb[2].mxu1 }
  0xe3   :  { %v497_v9 = vpop.f32.mrb[3].mxu1 }
 0x100   :  { %v676_v13 = vpop.f32.mrb[4].mxu1 }
 0x101   :  { %v677_v15 = vpop.f32.mrb[5].mxu1 }
 0x102   :  { %v678_v17 = vadd.f32 %v677_v15, %v676_v13  ;;  %v679_v18 = vpop.f32.mrb[6].mxu1 }
 0x103   :  { %v680_v19 = vpop.f32.mrb[7].mxu1 }
 0x104   :  { %v534_v22 = vadd.f32 %v678_v17, %v124_v16 }
 0x108   :  { %v573_v25 = vpop.f32.mrb[8].mxu1 }
 0x109   :  { %v574_v26 = vadd.f32 %v573_v25, %v534_v22  ;;  %v691_v27 = vpop.f32.mrb[9].mxu1 }
 0x10a   :  { %v576_v28 = vpop.f32.mrb[10].mxu1 }
 0x10b   :  { %v692_v14 = vpop.f32.mrb[11].mxu1  ;;  %v596_v41 = vrot.slane %v574_v26, %v838_v20 }
 0x115   :  { %v451_v31 = vpop.f32.mrb[0].mxu0 }
 0x116   :  { %v452_v32 = vadd.f32 %v451_v31, %v116_v29  ;;  %v453_v33 = vpop.f32.mrb[1].mxu0 }
 0x117   :  { %v454_v34 = vadd.f32 %v453_v33, %v120_v30  ;;  %v455_v35 = vpop.f32.mrb[2].mxu0 }
 0x118   :  { %v493_v36 = vadd.f32 %v492_v6, %v452_v32  ;;  %v456_v37 = vpop.f32.mrb[3].mxu0 }
 0x119   :  { %v495_v38 = vadd.f32 %v494_v7, %v454_v34 }
 0x11b   :  { %v582_v39 = vcombine.low %v493_v36, %v495_v38 }
 0x11d   :  { %v589_v40 = vrot.slane %v582_v39, %v838_v20 }
 0x11f   :  { %v597_v42 = vcombine.low %v589_v40, %v596_v41 }
 0x121   :  { %599 = vst [vmem:[%s991_s2] sm:$0x3f] %v597_v42 }

</bundles_post_ra>
